<compile_context>
chip_gen: v7x
topology: tpu7x:2x2x1
jax: 0.10.0
libtpu: 0.0.40
codegen_flags: <defaults>
</compile_context>

<pallas_src>
import functools

import numpy as np
import jax
import jax.numpy as jnp
from jax.experimental import pallas as pl
from jax.experimental.pallas import tpu as pltpu


# Padding logit: sigmoid -> 0, BCE -> 0, focal -> 0, dice num/den contribution -> 0,
# so lane/row padding needs no validity mask inside the kernel.
_PAD_LOGIT = -1e9
# Row granularity: safe sublane tiling for int8 targets and bf16 logits, and the unit
# of the megacore row split.
_ROW_GROUP = 32


def _round_up(x, m):
    return -(-x // m) * m


def _vmem_capacity_bytes():
    try:
        cap = int(getattr(pltpu.get_tpu_info(), "vmem_capacity_bytes"))
        if cap > 0:
            return cap
    except Exception:
        pass
    return 64 << 20  # conservative fallback (v7x per-TensorCore VMEM)


def _vmem_limit_bytes(block_bytes):
    cap = _vmem_capacity_bytes()
    need = 4 * block_bytes + (2 << 20)        # 2 inputs x 2 buffers + outputs/scratch
    return int(min(max(2 * need, 32 << 20), max(cap // 2, 32 << 20)))


# --------------------------------------------------------------------------
# Kernel 1: weighted cross-entropy (F.cross_entropy with class weights)
# --------------------------------------------------------------------------
def _weighted_ce_kernel(logits_ref, tgt_ref, w_ref, wnll_ref, wt_ref):
    x = logits_ref[...].astype(jnp.float32)                # (R, C1)
    t = tgt_ref[...]                                        # (R, 1) int32
    w = w_ref[...].astype(jnp.float32)                      # (1, C1)
    R, C1 = x.shape
    cls = jax.lax.broadcasted_iota(jnp.int32, (R, C1), 1)
    onehot = (cls == t).astype(jnp.float32)                 # (R, C1)
    xmax = jnp.max(x, axis=-1, keepdims=True)
    lse = jnp.log(jnp.sum(jnp.exp(x - xmax), axis=-1, keepdims=True)) + xmax
    x_t = jnp.sum(onehot * x, axis=-1, keepdims=True)       # logit at target class
    w_t = jnp.sum(onehot * w, axis=-1, keepdims=True)       # weight of target class
    wnll_ref[...] = w_t * (lse - x_t)                       # per-row weighted NLL
    wt_ref[...] = w_t


def weighted_cross_entropy(logits_2d, targets_1d, weight_1d, sections=1):
    """Per-section mean of class-weighted NLL == F.cross_entropy(weight=...) per layer.

    Rows are laid out section-major (main layer rows first, then each aux layer).
    Returns an array of shape (sections,).  At ATM sizes the whole problem fits in
    one VMEM block; the tiny per-layer reduction runs outside on (R,) scalars.
    """
    R, C1 = logits_2d.shape
    assert R % sections == 0
    # TODO(synk): for very large B*Q add a row-tiled grid; at ATM sizes this call is
    # dispatch-bound, which batching all decoder layers into one call already fixes.
    wnll, wt = pl.pallas_call(
        _weighted_ce_kernel,
        out_shape=(jax.ShapeDtypeStruct((R, 1), jnp.float32),
                   jax.ShapeDtypeStruct((R, 1), jnp.float32)),
        in_specs=[pl.BlockSpec(memory_space=pltpu.MemorySpace.VMEM)] * 3,
        out_specs=(pl.BlockSpec(memory_space=pltpu.MemorySpace.VMEM),) * 2,
    )(logits_2d.astype(jnp.float32),
      targets_1d.reshape(R, 1).astype(jnp.int32),
      weight_1d.reshape(1, C1).astype(jnp.float32))
    wnll = wnll.reshape(sections, R // sections)
    wt = wt.reshape(sections, R // sections)
    return jnp.sum(wnll, axis=1) / jnp.sum(wt, axis=1)


# --------------------------------------------------------------------------
# Kernel 2: sigmoid focal loss + dice loss over (R, L) flattened masks
# --------------------------------------------------------------------------
def _choose_mask_tiling(R, L, src_bytes, tgt_bytes=1):
    """Row/lane tiling for the (R, L) focal+dice kernel.

    Rows are blocked in _ROW_GROUP chunks (int8/bf16-safe sublane tiling, and >= 2
    row blocks for the v7x megacore whenever R >= 64).  The lane tile is a multiple
    of 128, sized for <= ~2 MiB per input block (keeps the first DMA small, keeps
    double-buffering effective, stays far inside v7x's 64 MiB/TC VMEM) and is chosen
    as a divisor of L when L % 128 == 0 so no wrapper-side lane padding is needed.
    """
    assert R % _ROW_GROUP == 0
    row_block = _ROW_GROUP
    n_row_blocks = R // row_block
    unit = 128
    n_units = -(-L // unit)
    per_unit = row_block * unit * (src_bytes + tgt_bytes)
    max_units_bytes = max((2 << 20) // per_unit, 1)                 # ~2 MiB block cap
    max_units_steps = max((n_units * n_row_blocks) // 8, 1)         # >= ~8 grid steps
    max_units = max(min(max_units_bytes, max_units_steps, n_units), 1)
    if L % unit == 0:
        t = max_units
        while n_units % t:          # largest divisor of n_units <= max_units
            t -= 1
    else:
        t = max_units
    lane_tile = t * unit
    L_pad = _round_up(L, lane_tile)
    return n_row_blocks, row_block, lane_tile, L_pad, L_pad // lane_tile


def _mask_loss_kernel(src_ref, tgt_ref, focal_ref, dice_ref,
                      foc_acc, num_acc, den_acc, *, inv_L, alpha, gamma):
    j = pl.program_id(1)

    # Accumulators are reset at j == 0 of every row block, so the pattern is correct
    # per-core under the "parallel" row axis (each core runs complete j sweeps).
    @pl.when(j == 0)
    def _():
        foc_acc[...] = jnp.zeros_like(foc_acc)
        num_acc[...] = jnp.zeros_like(num_acc)
        den_acc[...] = jnp.zeros_like(den_acc)

    x = src_ref[...].astype(jnp.float32)                    # (R, T) logits
    t = tgt_ref[...].astype(jnp.float32)                    # (R, T) binary targets

    # One exp per element shared by sigmoid and the BCE log-term (single EUP slot).
    e = jnp.exp(-jnp.abs(x))                                 # exp(-|x|)
    d = 1.0 + e
    r = pl.reciprocal(d, approx=True)                        # EUP vrcp (free slot)
    r = r * (2.0 - d * r)                                    # one Newton step -> f32 accurate
    prob = jnp.where(x >= 0.0, r, e * r)                     # == sigmoid(x)
    ce = jnp.maximum(x, 0.0) - x * t + jnp.log1p(e)          # BCE-with-logits, stable

    q = jnp.abs(prob - t)                                    # == 1 - p_t for t in {0,1}
    mod = q * q if gamma == 2.0 else q ** gamma              # gamma==2 -> plain VPU square
    loss = ce * mod
    if alpha >= 0:
        alpha_t = (1.0 - alpha) + (2.0 * alpha - 1.0) * t    # == alpha*t + (1-alpha)*(1-t)
        loss = alpha_t * loss

    # Lane-only (per-row) accumulation; cross-row reduce happens outside the kernel.
    foc_acc[...] += jnp.sum(loss, axis=-1, keepdims=True)
    num_acc[...] += jnp.sum(prob * t, axis=-1, keepdims=True)
    den_acc[...] += jnp.sum(prob + t, axis=-1, keepdims=True)

    @pl.when(j == pl.num_programs(1) - 1)
    def _():
        focal_ref[...] = foc_acc[...] * inv_L                # per-row focal mean over L
        dice_ref[...] = 1.0 - (2.0 * num_acc[...] + 1.0) / (den_acc[...] + 1.0)


def mask_losses_rows(src_rows, tgt_rows_i8, valid_lanes, alpha=0.25, gamma=2.0):
    """Per-row sigmoid-focal (mean over `valid_lanes`) and dice losses.

    src_rows:    (R, L) float logits (bf16 or f32), R a multiple of 32; rows may be
                 laid out layer-major over several decoder layers (R = n_layers*Rt)
                 with padding rows filled with _PAD_LOGIT.
    tgt_rows_i8: (Rt, L) int8 binary targets, Rt a multiple of 32, reused cyclically
                 across the R // Rt layer groups via a modulo index_map (never tiled
                 in HBM).
    Returns (focal_rows, dice_rows), each (R, 1) float32; padding rows are exactly 0.
    """
    R, L = src_rows.shape
    Rt, Lt = tgt_rows_i8.shape
    assert L == Lt and R % _ROW_GROUP == 0 and Rt % _ROW_GROUP == 0 and R % Rt == 0

    src_bytes = jnp.dtype(src_rows.dtype).itemsize
    n_rb, row_block, lane_tile, L_pad, n_lt = _choose_mask_tiling(R, L, src_bytes, 1)

    src, tgt = src_rows, tgt_rows_i8
    if L_pad != L:
        # Only for odd L; typical H*W is a multiple of 128 and no pad pass is emitted.
        src = jnp.pad(src, ((0, 0), (0, L_pad - L)), constant_values=_PAD_LOGIT)
        tgt = jnp.pad(tgt, ((0, 0), (0, L_pad - L)))

    tgt_blocks = Rt // row_block
    kernel = functools.partial(_mask_loss_kernel, inv_L=1.0 / float(valid_lanes),
                               alpha=float(alpha), gamma=float(gamma))
    block_bytes = row_block * lane_tile * (src_bytes + 1)

    focal_rows, dice_rows = pl.pallas_call(
        kernel,
        out_shape=(jax.ShapeDtypeStruct((R, 1), jnp.float32),
                   jax.ShapeDtypeStruct((R, 1), jnp.float32)),
        grid_spec=pltpu.PrefetchScalarGridSpec(
            num_scalar_prefetch=0,
            grid=(n_rb, n_lt),
            in_specs=[
                pl.BlockSpec((row_block, lane_tile), lambda i, j: (i, j)),
                # targets reused across decoder layers without tiling them in HBM
                pl.BlockSpec((row_block, lane_tile), lambda i, j: (i % tgt_blocks, j)),
                # NOTE: add pipeline_mode=pl.Buffered(3) here if DMA is still exposed
                # on v5e after the ~2 MiB block cap.
            ],
            out_specs=[pl.BlockSpec((row_block, 1), lambda i, j: (i, 0)),
                       pl.BlockSpec((row_block, 1), lambda i, j: (i, 0))],
            scratch_shapes=[pltpu.VMEM((row_block, 1), jnp.float32)] * 3),
        compiler_params=pltpu.CompilerParams(
            dimension_semantics=("parallel", "arbitrary"),
            vmem_limit_bytes=_vmem_limit_bytes(block_bytes)),
    )(src, tgt)
    return focal_rows, dice_rows


def mask_losses(src_flat, tgt_flat, num_masks, alpha=0.25, gamma=2.0,
                src_dtype=jnp.bfloat16):
    """Scalar (sigmoid_focal_loss, dice_loss) matching the PyTorch reference.

    Convenience wrapper (used by the self-checks): pads rows to a multiple of 32 with
    zero-contribution rows and sums the per-row kernel outputs.
    """
    N, L = src_flat.shape
    if N == 0:
        z = jnp.float32(0.0)
        return z, z
    N_pad = _round_up(N, _ROW_GROUP)
    src = jnp.asarray(src_flat, src_dtype)
    tgt = jnp.asarray(tgt_flat).astype(jnp.int8)
    if N_pad != N:
        src = jnp.pad(src, ((0, N_pad - N), (0, 0)), constant_values=_PAD_LOGIT)
        tgt = jnp.pad(tgt, ((0, N_pad - N), (0, 0)))
    focal_rows, dice_rows = mask_losses_rows(src, tgt, L, alpha, gamma)
    return jnp.sum(focal_rows) / num_masks, jnp.sum(dice_rows) / num_masks


# --------------------------------------------------------------------------
# ATMLoss forward (SetCriterion with losses = ['labels', 'masks'])
# --------------------------------------------------------------------------
def atm_loss_forward(outputs, label_np, ignore_index, num_classes, dec_layers,
                     mask_weight=20.0, dice_weight=1.0, cls_weight=1.0,
                     loss_weight=1.0, eos_coef=0.1):
    # ---- prepare_targets (data-dependent torch.unique -> host glue) ----
    # TODO(synk): torch.unique / per-class mask building is data-dependent host glue,
    # not expressible as a static-shape Pallas kernel.
    targets = []
    for img in label_np:
        gt = np.unique(img)
        gt = gt[gt != ignore_index]
        if len(gt) == 0:
            masks = [img == ignore_index]
        else:
            masks = [img == c for c in gt]
        targets.append({"labels": gt.astype(np.int64),
                        "masks": np.stack(masks, axis=0)})

    # num_masks (single device: world_size == 1, no all_reduce)
    num_masks = max(float(sum(len(t["labels"]) for t in targets)), 1.0)

    # weight_dict from ATMLoss.__init__
    base = {"loss_ce": cls_weight, "loss_mask": mask_weight, "loss_dice": dice_weight}
    weight_dict = dict(base)
    for i in range(dec_layers - 1):
        weight_dict.update({k + f"_{i}": v for k, v in base.items()})

    empty_weight = np.ones(num_classes + 1, np.float32)
    empty_weight[-1] = eos_coef
    empty_weight = jnp.asarray(empty_weight)

    # Main output first, then aux layers; losses get suffixes "", "_0", "_1", ...
    layer_outs = [{k: v for k, v in outputs.items() if k != "aux_outputs"}]
    suffixes = [""]
    for i, aux in enumerate(outputs.get("aux_outputs", [])):
        layer_outs.append(aux)
        suffixes.append(f"_{i}")
    n_layers = len(layer_outs)

    # ---- classification loss: one batched kernel call for all decoder layers ----
    pred_logits0 = jnp.asarray(layer_outs[0]["pred_logits"], jnp.float32)
    B, Q, C1 = pred_logits0.shape
    # ATM binds query index == class id (indices = [labels, arange]); labels are
    # guaranteed < Q == num_classes, same as the original module.
    tgt_classes = np.full((B, Q), num_classes, np.int32)
    for b, t in enumerate(targets):
        if len(t["labels"]):
            tgt_classes[b, t["labels"]] = t["labels"]
    logits_all = jnp.concatenate(
        [jnp.asarray(o["pred_logits"], jnp.float32).reshape(B * Q, C1)
         for o in layer_outs], axis=0)
    tgt_all = jnp.asarray(np.tile(tgt_classes.reshape(-1), n_layers))
    ce_all = weighted_cross_entropy(logits_all, tgt_all, empty_weight,
                                    sections=n_layers)              # (n_layers,)

    # ---- mask losses (focal + dice): one batched kernel call for all layers ----
    N = sum(len(t["labels"]) for t in targets)
    if N > 0:
        Ht, Wt = label_np.shape[-2:]
        L = Ht * Wt
        N_pad = _round_up(N, _ROW_GROUP)

        # Binary targets built directly as int8 on the host (no device cast pass),
        # already row-padded; a single (N_pad, L) array reused for every layer.
        tgt_flat = np.zeros((N_pad, L), np.int8)
        row = 0
        for t in targets:
            n = len(t["labels"])
            if n:
                tgt_flat[row:row + n] = t["masks"].reshape(n, L).astype(np.int8)
                row += n
        tgt_flat = jnp.asarray(tgt_flat)

        # Gather matched low-res predicted masks per layer; pad rows BEFORE the
        # resize (pad pass happens at low resolution only).
        src_layers = []
        for o in layer_outs:
            pm = jnp.asarray(o["pred_masks"], jnp.float32)           # (B, Q, h, w)
            chunks = [pm[b, np.asarray(t["labels"])]
                      for b, t in enumerate(targets) if len(t["labels"])]
            src = jnp.concatenate(chunks, axis=0)                    # (N, h, w)
            src = jnp.pad(src, ((0, N_pad - N), (0, 0), (0, 0)),
                          constant_values=_PAD_LOGIT)
            src_layers.append(src)
        src_all = jnp.concatenate(src_layers, axis=0)                # (n_layers*N_pad, h, w)

        # F.interpolate(mode='bilinear', align_corners=False) glue (half-pixel), one
        # pass for all layers; stored bf16 to halve the kernel's HBM read.
        # TODO(synk): fuse this resize into the mask kernel (Rh @ x @ Rw^T on the MXU)
        # to avoid materialising the full-resolution logits in HBM at all.
        src_all = jax.image.resize(src_all, (n_layers * N_pad, Ht, Wt),
                                   method="bilinear", antialias=False)
        src_all = src_all.astype(jnp.bfloat16).reshape(n_layers * N_pad, L)

        focal_rows, dice_rows = mask_losses_rows(src_all, tgt_flat, L)
        focal_l = jnp.sum(focal_rows.reshape(n_layers, N_pad), axis=1) / num_masks
        dice_l = jnp.sum(dice_rows.reshape(n_layers, N_pad), axis=1) / num_masks
    else:
        # No matched masks in the whole batch: empty sums -> 0 (matches PyTorch).
        focal_l = jnp.zeros((n_layers,), jnp.float32)
        dice_l = jnp.zeros((n_layers,), jnp.float32)

    losses = {}
    for li, suf in enumerate(suffixes):
        losses["loss_ce" + suf] = ce_all[li]
        losses["loss_mask" + suf] = focal_l[li]
        losses["loss_dice" + suf] = dice_l[li]

    # final weighting (ATMLoss.forward); keys not in weight_dict are dropped
    weighted = {}
    for k, v in losses.items():
        if k in weight_dict:
            weighted[k] = v * weight_dict[k] * loss_weight
    return weighted


# --------------------------------------------------------------------------
# numpy references for kernel self-checks
# --------------------------------------------------------------------------
def _ref_weighted_ce(logits, tgt, w):
    logits = np.asarray(logits, np.float64)
    tgt = np.asarray(tgt)
    w = np.asarray(w, np.float64)
    x = logits - logits.max(-1, keepdims=True)
    logp = x - np.log(np.exp(x).sum(-1, keepdims=True))
    nll = -logp[np.arange(len(tgt)), tgt]
    wt = w[tgt]
    return (wt * nll).sum() / wt.sum()


def _ref_mask_losses(src, tgt, num_masks, alpha=0.25, gamma=2.0):
    src = np.asarray(src, np.float64)
    tgt = np.asarray(tgt, np.float64)
    prob = 1.0 / (1.0 + np.exp(-src))
    ce = np.maximum(src, 0.0) - src * tgt + np.log1p(np.exp(-np.abs(src)))
    p_t = prob * tgt + (1 - prob) * (1 - tgt)
    loss = ce * (1 - p_t) ** gamma
    loss = (alpha * tgt + (1 - alpha) * (1 - tgt)) * loss
    focal = loss.mean(1).sum() / num_masks
    numr = 2 * (prob * tgt).sum(-1)
    den = prob.sum(-1) + tgt.sum(-1)
    dice = (1 - (numr + 1) / (den + 1)).sum() / num_masks
    return focal, dice


if __name__ == "__main__":
    B, H, W = 2, 16, 16
    num_classes = 6
    Q = num_classes                 # ATM uses one query per class
    h, w = 8, 8                     # predicted mask resolution (upsampled to H, W)
    ignore_index = 255
    dec_layers = 2                  # -> one aux output

    key = jax.random.PRNGKey(0)
    k1, k2, k3, k4, k5, k6 = jax.random.split(key, 6)

    # segmentation label map with some ignore pixels
    label = jax.random.randint(k1, (B, H, W), 0, num_classes)
    ign = jax.random.uniform(k2, (B, H, W)) < 0.08
    label = jnp.where(ign, ignore_index, label)
    label_np = np.asarray(label).astype(np.int64)

    outputs = {
        "pred_logits": jax.random.normal(k3, (B, Q, num_classes + 1), jnp.float32),
        "pred_masks": jax.random.normal(k4, (B, Q, h, w), jnp.float32),
        "aux_outputs": [{
            "pred_logits": jax.random.normal(k5, (B, Q, num_classes + 1), jnp.float32),
            "pred_masks": jax.random.normal(k6, (B, Q, h, w), jnp.float32),
        }],
    }

    # ---- kernel self-checks against numpy references ----
    ck = jax.random.PRNGKey(7)
    c1, c2, c3, c4 = jax.random.split(ck, 4)

    # weighted CE, single section
    lg = jax.random.normal(c1, (16, num_classes + 1), jnp.float32)
    tg = jax.random.randint(c2, (16,), 0, num_classes + 1)
    wt = jnp.concatenate([jnp.ones((num_classes,), jnp.float32),
                          jnp.array([0.1], jnp.float32)])
    ce_k = jax.block_until_ready(weighted_cross_entropy(lg, tg, wt, sections=1))
    np.testing.assert_allclose(float(ce_k[0]), _ref_weighted_ce(lg, tg, wt),
                               rtol=2e-4, atol=1e-5)

    # weighted CE, two sections (batched decoder layers in one call)
    lg2 = jnp.concatenate([lg, lg * 0.5], axis=0)
    tg2 = jnp.concatenate([tg, tg], axis=0)
    ce2 = np.asarray(jax.block_until_ready(
        weighted_cross_entropy(lg2, tg2, wt, sections=2)))
    np.testing.assert_allclose(ce2[0], _ref_weighted_ce(lg, tg, wt), rtol=2e-4, atol=1e-5)
    np.testing.assert_allclose(ce2[1], _ref_weighted_ce(lg * 0.5, tg, wt),
                               rtol=2e-4, atol=1e-5)

    # focal + dice, f32 logits (exact-math check)
    sm = jax.random.normal(c3, (5, 256), jnp.float32)
    tm = jax.random.uniform(c4, (5, 256)) > 0.5
    fk, dk = mask_losses(sm, tm, 5.0, src_dtype=jnp.float32)
    fk, dk = float(jax.block_until_ready(fk)), float(jax.block_until_ready(dk))
    fr, dr = _ref_mask_losses(np.asarray(sm), np.asarray(tm).astype(np.float64), 5.0)
    np.testing.assert_allclose(fk, fr, rtol=2e-4, atol=1e-5)
    np.testing.assert_allclose(dk, dr, rtol=2e-4, atol=1e-5)

    # focal + dice, bf16 logit storage (forward path) vs reference on bf16-rounded logits
    sm_bf = np.asarray(jnp.asarray(sm, jnp.bfloat16).astype(jnp.float32))
    fk16, dk16 = mask_losses(sm, tm, 5.0, src_dtype=jnp.bfloat16)
    fk16, dk16 = float(jax.block_until_ready(fk16)), float(jax.block_until_ready(dk16))
    fr16, dr16 = _ref_mask_losses(sm_bf, np.asarray(tm).astype(np.float64), 5.0)
    np.testing.assert_allclose(fk16, fr16, rtol=2e-4, atol=1e-5)
    np.testing.assert_allclose(dk16, dr16, rtol=2e-4, atol=1e-5)

    # layer-batched path: row padding + target reuse across layers via modulo index_map
    k5a, k5b = jax.random.split(jax.random.PRNGKey(11))
    n_real, Lc = 20, 384
    s0 = jax.random.normal(k5a, (2, n_real, Lc), jnp.float32)   # two "decoder layers"
    tmr = jax.random.uniform(k5b, (n_real, Lc)) > 0.5
    N_pad = _round_up(n_real, _ROW_GROUP)
    src_all = jnp.concatenate(
        [jnp.pad(s0[l], ((0, N_pad - n_real), (0, 0)), constant_values=_PAD_LOGIT)
         for l in range(2)], axis=0)
    tgt_pad = jnp.pad(jnp.asarray(tmr, jnp.int8), ((0, N_pad - n_real), (0, 0)))
    frows, drows = mask_losses_rows(src_all, tgt_pad, Lc)
    frows, drows = jax.block_until_ready((frows, drows))
    f_l = np.asarray(jnp.sum(frows.reshape(2, N_pad), axis=1))
    d_l = np.asarray(jnp.sum(drows.reshape(2, N_pad), axis=1))
    for l in range(2):
        fr_l, dr_l = _ref_mask_losses(np.asarray(s0[l]),
                                      np.asarray(tmr).astype(np.float64), 1.0)
        np.testing.assert_allclose(f_l[l], fr_l, rtol=2e-4, atol=1e-5)
        np.testing.assert_allclose(d_l[l], dr_l, rtol=2e-4, atol=1e-5)

    # ---- full ATMLoss forward ----
    losses = atm_loss_forward(outputs, label_np, ignore_index,
                              num_classes=num_classes, dec_layers=dec_layers,
                              mask_weight=20.0, dice_weight=1.0,
                              cls_weight=1.0, loss_weight=1.0)
    expected_keys = {"loss_ce", "loss_mask", "loss_dice",
                     "loss_ce_0", "loss_mask_0", "loss_dice_0"}
    assert set(losses) == expected_keys, sorted(losses)
    vals = jax.block_until_ready([losses[k] for k in sorted(losses)])
    assert all(np.isfinite(float(v)) for v in vals)
    print("KERNEL_OK")
</pallas_src>

<mosaic_0001>
module attributes {stable_mosaic.version = 11 : i64} {
  func.func @_weighted_ce_kernel(%arg0: memref<16x7xf32, #tpu.memory_space<vmem>>, %arg1: memref<16x1xi32, #tpu.memory_space<vmem>>, %arg2: memref<1x7xf32, #tpu.memory_space<vmem>>, %arg3: memref<16x1xf32, #tpu.memory_space<vmem>>, %arg4: memref<16x1xf32, #tpu.memory_space<vmem>>) attributes {dimension_semantics = [], scalar_prefetch = 0 : i64, scratch_operands = 0 : i64, tpu.core_type = #tpu.core_type<tc>} {
    %c0 = arith.constant 0 : index
    %c0_0 = arith.constant 0 : index
    %0 = vector.load %arg0[%c0, %c0_0] : memref<16x7xf32, #tpu.memory_space<vmem>>, vector<16x7xf32>
    %c0_1 = arith.constant 0 : index
    %c0_2 = arith.constant 0 : index
    %1 = vector.load %arg1[%c0_1, %c0_2] : memref<16x1xi32, #tpu.memory_space<vmem>>, vector<16x1xi32>
    %c0_3 = arith.constant 0 : index
    %c0_4 = arith.constant 0 : index
    %2 = vector.load %arg2[%c0_3, %c0_4] : memref<1x7xf32, #tpu.memory_space<vmem>>, vector<1x7xf32>
    %3 = tpu.iota {dimensions = array<i32: 1>} : vector<16x7xi32>
    %4 = vector.broadcast %1 : vector<16x1xi32> to vector<16x7xi32>
    %5 = arith.cmpi eq, %3, %4 : vector<16x7xi32>
    %6 = arith.extui %5 : vector<16x7xi1> to vector<16x7xi32>
    %7 = arith.sitofp %6 : vector<16x7xi32> to vector<16x7xf32>
    %cst = arith.constant dense<0xFF800000> : vector<16xf32>
    %8 = vector.multi_reduction <maximumf>, %0, %cst [1] : vector<16x7xf32> to vector<16xf32>
    %9 = vector.shape_cast %8 : vector<16xf32> to vector<16x1xf32>
    %10 = vector.broadcast %9 : vector<16x1xf32> to vector<16x7xf32>
    %11 = arith.subf %0, %10 : vector<16x7xf32>
    %12 = math.exp %11 : vector<16x7xf32>
    %cst_5 = arith.constant dense<0.000000e+00> : vector<16xf32>
    %13 = vector.multi_reduction <add>, %12, %cst_5 [1] : vector<16x7xf32> to vector<16xf32>
    %14 = vector.shape_cast %13 : vector<16xf32> to vector<16x1xf32>
    %15 = math.log %14 : vector<16x1xf32>
    %16 = arith.addf %15, %9 : vector<16x1xf32>
    %17 = arith.mulf %7, %0 : vector<16x7xf32>
    %cst_6 = arith.constant dense<0.000000e+00> : vector<16xf32>
    %18 = vector.multi_reduction <add>, %17, %cst_6 [1] : vector<16x7xf32> to vector<16xf32>
    %19 = vector.shape_cast %18 : vector<16xf32> to vector<16x1xf32>
    %20 = vector.broadcast %2 : vector<1x7xf32> to vector<16x7xf32>
    %21 = arith.mulf %7, %20 : vector<16x7xf32>
    %cst_7 = arith.constant dense<0.000000e+00> : vector<16xf32>
    %22 = vector.multi_reduction <add>, %21, %cst_7 [1] : vector<16x7xf32> to vector<16xf32>
    %23 = vector.shape_cast %22 : vector<16xf32> to vector<16x1xf32>
    %24 = arith.subf %16, %19 : vector<16x1xf32>
    %25 = arith.mulf %23, %24 : vector<16x1xf32>
    %c0_8 = arith.constant 0 : index
    %c0_9 = arith.constant 0 : index
    %26 = vector.load %arg3[%c0_8, %c0_9] : memref<16x1xf32, #tpu.memory_space<vmem>>, vector<16x1xf32>
    tpu.vector_store %arg3[%c0_8, %c0_9], %25 {strides = array<i32>} : memref<16x1xf32, #tpu.memory_space<vmem>>, vector<16x1xf32>,
    %c0_10 = arith.constant 0 : index
    %c0_11 = arith.constant 0 : index
    %27 = vector.load %arg4[%c0_10, %c0_11] : memref<16x1xf32, #tpu.memory_space<vmem>>, vector<16x1xf32>
    tpu.vector_store %arg4[%c0_10, %c0_11], %23 {strides = array<i32>} : memref<16x1xf32, #tpu.memory_space<vmem>>, vector<16x1xf32>,
    return
  }
}

</mosaic_0001>

<bundles_post_ra>
// kernel: tpu_custom_call.1
= control target key start
LH: loop header
LB: loop body
LE: loop exit
PB: predicated region body
PF: predicated region fallthrough
CT: control target
= control target key end

     0   :  { %vm35_vm0 = vcmask 56320   ;;  %v114_v2 = vmov 0   ;;  %v21_v8 = vlaneseq  ;;  %v115_v17 = vmov 0.0   ;;  %s180_s0 = inlined_call_operand.vmem [shape: f32[16,7], index: 0, kind: input, shape index: {}]   ;;  %s181_s1 = inlined_call_operand.vmem [shape: s32[16,1], index: 1, kind: input, shape index: {}]   ;;  %s182_s2 = inlined_call_operand.vmem [shape: f32[1,7], index: 2, kind: input, shape index: {}]   ;;  %s183_s4 = inlined_call_operand.vmem [shape: f32[16,1], index: 4, kind: output, shape index: {1}]   ;;  %s184_s3 = inlined_call_operand.vmem [shape: f32[16,1], index: 3, kind: output, shape index: {0}]  }
   0x1   :  { %v16_v0 = vld [vmem:[%s180_s0] sm:$0xff]  ;;  %v17_v1 = vld [vmem:[%s180_s0 + $0x8] sm:$0xff]  ;;  %104 = vset.pattern.permute.xlu1 %v114_v2  ;;  %105 = vset.pattern.permute.xlu0 %v114_v2  ;;  %vm86_vm3 = vcmask 7168  }
   0x2   :  { %v18_v3 = vld [vmem:[%s181_s1] sm:$0xff]  ;;  %v36_v4 = vsel %vm35_vm0, %v16_v0, -inf  ;;  %v19_v5 = vld [vmem:[%s181_s1 + $0x8] sm:$0xff]  ;;  %v39_v6 = vsel %vm35_vm0, %v17_v1, -inf  ;;  %v22_v13 = vand.u32 127, %v21_v8 }
   0x3   :  { %24 = vperm.xlu1 %104, %v18_v3   ;;  %37 = vmax.xlane.f32.xlu0 %v36_v4  ;;  %v101_v27 = vld [vmem:[%s182_s2] ss:$0 sm:$0xff] }
   0x7   :  { %27 = vperm.xlu1 %104, %v19_v5   ;;  %40 = vmax.xlane.f32.xlu0 %v39_v6 }
  0x82   :  { %v25_v11 = vpop.permute.xlu1 %24 }
  0x83   :  { %vm29_vm1 = vcmp.eq.s32.totalorder %v22_v13, %v25_v11 }
  0x84   :  { %v99_v18 = vsel %vm29_vm1, 1.0, %v115_v17 }
  0x85   :  { %v60_v19 = vmul.f32 %v99_v18, %v16_v0  ;;  %v74_v29 = vmul.f32 %v101_v27, %v99_v18 }
  0x86   :  { %v28_v16 = vpop.permute.xlu1 %27 }
  0x87   :  { %vm30_vm2 = vcmp.eq.s32.totalorder %v22_v13, %v28_v16  ;;  %v62_v23 = vsel %vm35_vm0, %v60_v19, 0.0  ;;  %v76_v30 = vsel %vm35_vm0, %v74_v29, 0.0 }
  0x88   :  { %v100_v21 = vsel %vm30_vm2, 1.0, %v115_v17 }
  0x89   :  { %v61_v24 = vmul.f32 %v100_v21, %v17_v1  ;;  %v75_v31 = vmul.f32 %v101_v27, %v100_v21 }
  0x8b   :  { %v65_v28 = vsel %vm35_vm0, %v61_v24, 0.0  ;;  %v79_v32 = vsel %vm35_vm0, %v75_v31, 0.0 }
  0x90   :  { %v38_v7 = vpop.xlane.xlu0 %37 }
  0x91   :  { %v42_v9 = vsub.f32 %v16_v0, %v38_v7 }
  0x93   :  { %v44_v10 = vmul.f32 1.442695, %v42_v9 }
  0x94   :  { %v41_v12 = vpop.xlane.xlu0 %40 }
  0x95   :  { %106 = vpow2.f32 %v44_v10  ;;  %v43_v14 = vsub.f32 %v17_v1, %v41_v12 }
  0x97   :  { %v46_v15 = vmul.f32 1.442695, %v43_v14 }
  0x99   :  { %108 = vpow2.f32 %v46_v15 }
  0x9f   :  { %v107_v20 = vpop.eup %106 }
  0xa0   :  { %v48_v22 = vsel %vm35_vm0, %v107_v20, 0.0 }
  0xa1   :  { %49 = vadd.xlane.f32.xlu0 %v48_v22 }
  0xa3   :  { %v109_v25 = vpop.eup %108 }
  0xa4   :  { %v51_v26 = vsel %vm35_vm0, %v109_v25, 0.0 }
  0xa5   :  { %63 = vadd.xlane.f32.xlu0 %v62_v23  ;;  %52 = vadd.xlane.f32.xlu1 %v51_v26 }
  0xa9   :  { %66 = vadd.xlane.f32.xlu0 %v65_v28 }
  0xad   :  { %77 = vadd.xlane.f32.xlu0 %v76_v30 }
  0xb1   :  { %80 = vadd.xlane.f32.xlu0 %v79_v32 }
 0x12e   :  { %v50_v33 = vpop.xlane.xlu0 %49 }
 0x12f   :  { %110 = vlog2.f32 %v50_v33 }
 0x132   :  { %v53_v34 = vpop.xlane.xlu1 %52  ;;  %v64_v35 = vpop.xlane.xlu0 %63 }
 0x133   :  { %112 = vlog2.f32 %v53_v34 }
 0x136   :  { %v67_v36 = vpop.xlane.xlu0 %66 }
 0x139   :  { %v111_v37 = vpop.eup %110 }
 0x13a   :  { %v55_v38 = vmul.f32 0.6931472, %v111_v37  ;;  %v78_v39 = vpop.xlane.xlu0 %77 }
 0x13b   :  { %89 = vst.msk [vmem:[%s183_s4] sm:$0xff] %vm86_vm3, %v78_v39 }
 0x13c   :  { %v58_v40 = vadd.f32 %v55_v38, %v38_v7 }
 0x13d   :  { %v113_v41 = vpop.eup %112 }
 0x13e   :  { %v57_v42 = vmul.f32 0.6931472, %v113_v41  ;;  %v82_v43 = vsub.f32 %v58_v40, %v64_v35  ;;  %v81_v44 = vpop.xlane.xlu0 %80 }
 0x13f   :  { %90 = vst.msk [vmem:[%s183_s4 + $0x8] sm:$0xff] %vm86_vm3, %v81_v44 }
 0x140   :  { %v59_v45 = vadd.f32 %v57_v42, %v41_v12  ;;  %v84_v46 = vmul.f32 %v82_v43, %v78_v39 }
 0x142   :  { %v83_v47 = vsub.f32 %v59_v45, %v67_v36  ;;  %87 = vst.msk [vmem:[%s184_s3] sm:$0xff] %vm86_vm3, %v84_v46 }
 0x144   :  { %v85_v48 = vmul.f32 %v83_v47, %v81_v44 }
 0x146   :  { %88 = vst.msk [vmem:[%s184_s3 + $0x8] sm:$0xff] %vm86_vm3, %v85_v48 }

</bundles_post_ra>
